<compile_context>
chip_gen: v7x
topology: tpu7x:2x2x1
jax: 0.10.0
libtpu: 0.0.40
codegen_flags: <defaults>
</compile_context>

<pallas_src>
import jax
import jax.numpy as jnp
from jax.experimental import pallas as pl
from jax.experimental.pallas import tpu as pltpu


EMBED_DIM = 768       # image_embedding == text_embedding == 768
PROJ_DIM = 256        # ProjectionHead projection_dim
LN_EPS = 1e-5         # nn.LayerNorm default eps
L2_EPS = 1e-12        # F.normalize default eps
MAX_TILE_B = 1024     # 1024-row bf16 tile: ~1.5 MiB x2 buffers for x,
                      # ~1 MiB x2 for out, <1 MiB resident weights -> far
                      # below the 32 MiB scoped-VMEM default (v5e/v6e) and
                      # v7x's 64 MiB physical VMEM.
COMPUTE_DTYPE = jnp.bfloat16   # HBM-facing dtype for x / w1 / w2
OUT_DTYPE = jnp.float32        # normalized-embedding output dtype
GELU_APPROXIMATE = True        # tanh GELU (EUP); False = exact erf parity


def _round_up(x, m):
    return ((x + m - 1) // m) * m


def _pick_tile_b(batch, row_pack):
    """Largest batch tile (<= MAX_TILE_B) that keeps padding waste modest.

    row_pack: sublane-packing minimum for the compute dtype (16 for bf16,
    8 for f32).  Small batches get a single rounded tile; larger batches get
    the biggest 128-multiple whose padded waste is <= ~12.5%.
    """
    b_packed = _round_up(batch, row_pack)
    if b_packed <= 128:
        return b_packed
    tile = 128
    for cand in (256, 512, 1024):
        if cand > MAX_TILE_B:
            break
        padded = _round_up(batch, cand)
        if (padded - batch) * 8 <= padded:      # <= 12.5% padded waste
            tile = cand
    return tile


def _projection_head_kernel(x_ref, w1_ref, w2_ref, pvec_ref, out_ref):
    """Fused ProjectionHead + L2-normalize for one (branch, batch-tile).

    x_ref:    [TB, E]   input features tile (compute dtype, e.g. bf16)
    w1_ref:   [E, P]    projection weight (in x out), compute dtype
    w2_ref:   [P, P]    fc weight (in x out), compute dtype
    pvec_ref: [4, P]    packed [b1; b2; ln_gamma; ln_beta] rows (f32)
    out_ref:  [TB, P]   L2-normalized embeddings tile
    """
    # Hoist parameter reads once.  Their BlockSpecs index only on the branch
    # grid axis, so they are not re-DMA'd across batch tiles.
    w1 = w1_ref[...]
    w2 = w2_ref[...]
    pvec = pvec_ref[...].astype(jnp.float32)
    b1 = pvec[0:1, :]
    b2 = pvec[1:2, :]
    gamma = pvec[2:3, :]
    beta = pvec[3:4, :]

    x = x_ref[...]

    # projected = self.projection(x)       (MXU, f32 accumulate)
    projected = jnp.dot(x, w1, preferred_element_type=jnp.float32) + b1

    # x = self.gelu(projected)
    # tanh form runs on the EUP slot; exact erf available via the flag.
    h = jax.nn.gelu(projected, approximate=GELU_APPROXIMATE)

    # x = self.fc(x)   (cast back to MXU-native dtype, f32 accumulate)
    h = jnp.dot(h.astype(w2.dtype), w2,
                preferred_element_type=jnp.float32) + b2

    # x = self.dropout(x)  -> identity (eval / deterministic forward)

    # x = x + projected
    y = h + projected

    # x = self.layer_norm(x)   (biased variance, eps inside rsqrt, all f32)
    mean = jnp.mean(y, axis=-1, keepdims=True)
    centered = y - mean
    var = jnp.mean(centered * centered, axis=-1, keepdims=True)
    y_ln = centered * jax.lax.rsqrt(var + LN_EPS)
    y_ln = y_ln * gamma + beta

    # F.normalize(x, p=2, dim=1) == x / max(||x||_2, eps)
    # rsqrt(max(sumsq, eps^2)) == 1 / max(||x||, eps)  (sqrt is monotone),
    # replacing sqrt + full-tile divide with one rsqrt + a multiply.
    sumsq = jnp.sum(y_ln * y_ln, axis=-1, keepdims=True)
    inv_norm = jax.lax.rsqrt(jnp.maximum(sumsq, L2_EPS * L2_EPS))
    out_ref[...] = (y_ln * inv_norm).astype(out_ref.dtype)


def dual_projection_head_normalize(feats, stacked_params,
                                   compute_dtype=COMPUTE_DTYPE,
                                   out_dtype=OUT_DTYPE):
    """Run both projection heads (image + text) in one fused Pallas call.

    feats:          [2, B, EMBED_DIM]  (branch 0 = image, 1 = text), already
                    in `compute_dtype`.
    stacked_params: dict with "w1" [2,E,P], "w2" [2,P,P], "pvec" [2,4,P]
                    (pvec rows = b1, b2, ln_gamma, ln_beta).
    """
    n_branch, B, E = feats.shape
    assert E == EMBED_DIM and n_branch == 2

    # bf16 packs 2 rows per sublane -> round tiles to 16; f32 -> 8.
    row_pack = 16 if jnp.dtype(compute_dtype).itemsize == 2 else 8
    tile_b = _pick_tile_b(B, row_pack)
    b_pad = _round_up(B, tile_b)

    x = feats.astype(compute_dtype)
    if b_pad != B:
        x = jnp.pad(x, ((0, 0), (0, b_pad - B), (0, 0)))
    num_tiles = b_pad // tile_b

    w1 = stacked_params["w1"].astype(compute_dtype)
    w2 = stacked_params["w2"].astype(compute_dtype)
    pvec = stacked_params["pvec"].astype(jnp.float32)

    flops = 2 * n_branch * b_pad * (EMBED_DIM * PROJ_DIM + PROJ_DIM * PROJ_DIM)
    bytes_accessed = (x.size * x.dtype.itemsize
                      + w1.size * w1.dtype.itemsize
                      + w2.size * w2.dtype.itemsize
                      + pvec.size * pvec.dtype.itemsize
                      + n_branch * b_pad * PROJ_DIM
                      * jnp.dtype(out_dtype).itemsize)
    cost = pl.CostEstimate(flops=flops,
                           transcendentals=n_branch * b_pad * PROJ_DIM,
                           bytes_accessed=bytes_accessed)

    # Grid = (branch, batch_tile).  Branch is the OUTER axis so per-branch
    # weights stay resident across all batch tiles of that branch.  Both axes
    # are fully independent -> "parallel" lets v7x split the two branches
    # across its two TensorCores (no effect on single-TC v5e/v6e).
    batch_map = lambda br, bi: (br, bi, 0)     # activations / output
    param_map = lambda br, bi: (br, 0, 0)      # branch-only -> VMEM-resident
    # NOTE: param BlockSpecs could use pipeline_mode=pl.Buffered(1) to drop
    # their pointless double buffer (~0.5 MiB); skipped as it only matters
    # when pushing tile_b + pipeline depth to the v7x VMEM ceiling.

    out = pl.pallas_call(
        _projection_head_kernel,
        out_shape=jax.ShapeDtypeStruct((n_branch, b_pad, PROJ_DIM), out_dtype),
        grid=(n_branch, num_tiles),
        in_specs=[
            pl.BlockSpec((None, tile_b, EMBED_DIM), batch_map),      # x
            pl.BlockSpec((None, EMBED_DIM, PROJ_DIM), param_map),    # w1
            pl.BlockSpec((None, PROJ_DIM, PROJ_DIM), param_map),     # w2
            pl.BlockSpec((None, 4, PROJ_DIM), param_map),            # pvec
        ],
        out_specs=pl.BlockSpec((None, tile_b, PROJ_DIM), batch_map),
        compiler_params=pltpu.CompilerParams(
            dimension_semantics=("parallel", "parallel")),
        cost_estimate=cost,
    )(x, w1, w2, pvec)

    return out[:, :B, :]


def init_projection_head_params(key, embedding_dim=EMBED_DIM,
                                projection_dim=PROJ_DIM):
    k1, k2 = jax.random.split(key)
    scale1 = 1.0 / jnp.sqrt(embedding_dim)
    scale2 = 1.0 / jnp.sqrt(projection_dim)
    return {
        # stored as [in, out] (transpose of nn.Linear.weight)
        "w1": (jax.random.normal(k1, (embedding_dim, projection_dim),
                                 jnp.float32) * scale1),
        "b1": jnp.zeros((projection_dim,), jnp.float32),
        "w2": (jax.random.normal(k2, (projection_dim, projection_dim),
                                 jnp.float32) * scale2),
        "b2": jnp.zeros((projection_dim,), jnp.float32),
        "gamma": jnp.ones((projection_dim,), jnp.float32),
        "beta": jnp.zeros((projection_dim,), jnp.float32),
    }


def stack_projection_params(img_params, txt_params):
    """Stack the two heads' params ONCE (call at init, not per forward).

    Packs b1/b2/gamma/beta into a single [2, 4, PROJ_DIM] tensor so the kernel
    needs one BlockSpec / one small DMA per branch for all vector params.
    """
    def _pack(p):
        return jnp.stack([p["b1"], p["b2"], p["gamma"], p["beta"]], axis=0)
    return {
        "w1": jnp.stack([img_params["w1"], txt_params["w1"]], axis=0),
        "w2": jnp.stack([img_params["w2"], txt_params["w2"]], axis=0),
        "pvec": jnp.stack([_pack(img_params), _pack(txt_params)], axis=0),
    }


# --- deterministic placeholder encoders (plain-JAX glue) -------------------
# TODO(synk): vit()/SimCSE() bodies not provided; these stand-ins map inputs
#             deterministically to [B, 768] features.

def image_encoder(image_nchw):
    # image layout NCHW: [B, 3, 16, 16] -> flatten -> [B, 768]
    B = image_nchw.shape[0]
    return image_nchw.reshape(B, -1).astype(jnp.float32)


def text_encoder(input_ids, attention_mask, token_type_ids, embed_table):
    # masked mean-pool of token embeddings -> [B, 768]
    emb = embed_table[input_ids]                       # [B, S, E]
    mask = attention_mask[..., None].astype(jnp.float32)
    pooled = jnp.sum(emb * mask, axis=1) / jnp.maximum(
        jnp.sum(mask, axis=1), 1.0)
    # token_type_ids unused by the placeholder encoder
    del token_type_ids
    return pooled.astype(jnp.float32)


@jax.jit
def clip_plus_vit_forward(image, input_ids, attention_mask, token_type_ids,
                          embed_table, stacked_proj_params):
    image_features = image_encoder(image)                       # [B, 768]
    text_features = text_encoder(input_ids, attention_mask,
                                 token_type_ids, embed_table)   # [B, 768]

    # Fuse both branches into one pallas_call.  Features are cast to the
    # compute dtype BEFORE stacking so the [2, B, 768] wrapper copy is
    # half-size; the per-branch parameter stack was hoisted to init time.
    feats = jnp.stack([image_features.astype(COMPUTE_DTYPE),
                       text_features.astype(COMPUTE_DTYPE)], axis=0)

    out = dual_projection_head_normalize(feats, stacked_proj_params)
    return out[0], out[1]


def _reference_heads(feats, stacked_params):
    """Pure-JAX mirror of the fused kernel (same dtypes / GELU form)."""
    x = feats.astype(COMPUTE_DTYPE)
    w1 = stacked_params["w1"].astype(COMPUTE_DTYPE)
    w2 = stacked_params["w2"].astype(COMPUTE_DTYPE)
    pv = stacked_params["pvec"].astype(jnp.float32)
    b1, b2 = pv[:, 0:1, :], pv[:, 1:2, :]
    gamma, beta = pv[:, 2:3, :], pv[:, 3:4, :]
    proj = jnp.einsum("kbe,kep->kbp", x, w1,
                      preferred_element_type=jnp.float32) + b1
    h = jax.nn.gelu(proj, approximate=GELU_APPROXIMATE)
    h = jnp.einsum("kbp,kpq->kbq", h.astype(COMPUTE_DTYPE), w2,
                   preferred_element_type=jnp.float32) + b2
    y = h + proj
    mean = jnp.mean(y, axis=-1, keepdims=True)
    var = jnp.mean((y - mean) ** 2, axis=-1, keepdims=True)
    y = (y - mean) * jax.lax.rsqrt(var + LN_EPS) * gamma + beta
    norm = jnp.sqrt(jnp.sum(y * y, axis=-1, keepdims=True))
    return (y / jnp.maximum(norm, L2_EPS)).astype(OUT_DTYPE)


if __name__ == "__main__":
    key = jax.random.PRNGKey(0)
    k_img, k_ids, k_vocab, k_ip, k_tp = jax.random.split(key, 5)

    B, C, H, W = 2, 3, 16, 16       # 3*16*16 = 768 = image embedding dim
    S, VOCAB = 8, 100

    image = jax.random.normal(k_img, (B, C, H, W), jnp.float32)          # NCHW
    input_ids = jax.random.randint(k_ids, (B, S), 0, VOCAB, jnp.int32)
    attention_mask = jnp.ones((B, S), jnp.float32)
    token_type_ids = jnp.zeros((B, S), jnp.int32)
    embed_table = jax.random.normal(k_vocab, (VOCAB, EMBED_DIM),
                                    jnp.float32) * 0.02

    img_proj_params = init_projection_head_params(k_ip)
    txt_proj_params = init_projection_head_params(k_tp)
    # Stack / pack parameters ONCE at init (hoisted out of the jitted forward).
    stacked_proj_params = stack_projection_params(img_proj_params,
                                                  txt_proj_params)

    image_norm, text_norm = clip_plus_vit_forward(
        image, input_ids, attention_mask, token_type_ids,
        embed_table, stacked_proj_params)
    jax.block_until_ready((image_norm, text_norm))

    assert image_norm.shape == (B, PROJ_DIM)
    assert text_norm.shape == (B, PROJ_DIM)
    assert bool(jnp.all(jnp.isfinite(image_norm)))
    assert bool(jnp.all(jnp.isfinite(text_norm)))
    # L2-normalized rows should have unit norm (normalize math is f32).
    assert jnp.allclose(jnp.linalg.norm(image_norm, axis=1), 1.0, atol=1e-4)
    assert jnp.allclose(jnp.linalg.norm(text_norm, axis=1), 1.0, atol=1e-4)

    # Cross-check the fused kernel against a pure-JAX mirror of the same math.
    feats = jnp.stack([image_encoder(image).astype(COMPUTE_DTYPE),
                       text_encoder(input_ids, attention_mask,
                                    token_type_ids,
                                    embed_table).astype(COMPUTE_DTYPE)],
                      axis=0)
    ref = _reference_heads(feats, stacked_proj_params)
    assert jnp.allclose(image_norm, ref[0], atol=2e-2)
    assert jnp.allclose(text_norm, ref[1], atol=2e-2)

    print("KERNEL_OK")
</pallas_src>

<mosaic_0001>
module attributes {stable_mosaic.version = 11 : i64} {
  func.func @_projection_head_kernel(%arg0: i32, %arg1: i32, %arg2: memref<1x16x768xbf16, #tpu.memory_space<vmem>>, %arg3: memref<1x768x256xbf16, #tpu.memory_space<vmem>>, %arg4: memref<1x256x256xbf16, #tpu.memory_space<vmem>>, %arg5: memref<1x4x256xf32, #tpu.memory_space<vmem>>, %arg6: memref<1x16x256xf32, #tpu.memory_space<vmem>>) attributes {dimension_semantics = [#tpu.dimension_semantics<parallel>, #tpu.dimension_semantics<parallel>], iteration_bounds = array<i64: 2, 1>, scalar_prefetch = 0 : i64, scratch_operands = 0 : i64, tpu.core_type = #tpu.core_type<tc>, window_params = [{transform_indices = @transform_0, window_bounds = array<i64: 1, 16, 768>}, {transform_indices = @transform_1, window_bounds = array<i64: 1, 768, 256>}, {transform_indices = @transform_2, window_bounds = array<i64: 1, 256, 256>}, {transform_indices = @transform_3, window_bounds = array<i64: 1, 4, 256>}, {transform_indices = @transform_4, window_bounds = array<i64: 1, 16, 256>}]} {
    %c0 = arith.constant 0 : index
    %c0_0 = arith.constant 0 : index
    %c0_1 = arith.constant 0 : index
    %0 = vector.load %arg3[%c0, %c0_0, %c0_1] : memref<1x768x256xbf16, #tpu.memory_space<vmem>>, vector<1x768x256xbf16>
    %1 = vector.shape_cast %0 : vector<1x768x256xbf16> to vector<768x256xbf16>
    %c0_2 = arith.constant 0 : index
    %c0_3 = arith.constant 0 : index
    %c0_4 = arith.constant 0 : index
    %2 = vector.load %arg4[%c0_2, %c0_3, %c0_4] : memref<1x256x256xbf16, #tpu.memory_space<vmem>>, vector<1x256x256xbf16>
    %3 = vector.shape_cast %2 : vector<1x256x256xbf16> to vector<256x256xbf16>
    %c0_5 = arith.constant 0 : index
    %c0_6 = arith.constant 0 : index
    %c0_7 = arith.constant 0 : index
    %4 = vector.load %arg5[%c0_5, %c0_6, %c0_7] : memref<1x4x256xf32, #tpu.memory_space<vmem>>, vector<1x4x256xf32>
    %5 = vector.shape_cast %4 : vector<1x4x256xf32> to vector<4x256xf32>
    %6 = vector.extract_strided_slice %5 {offsets = [0, 0], sizes = [1, 256], strides = [1, 1]} : vector<4x256xf32> to vector<1x256xf32>
    %7 = vector.extract_strided_slice %5 {offsets = [1, 0], sizes = [1, 256], strides = [1, 1]} : vector<4x256xf32> to vector<1x256xf32>
    %8 = vector.extract_strided_slice %5 {offsets = [2, 0], sizes = [1, 256], strides = [1, 1]} : vector<4x256xf32> to vector<1x256xf32>
    %9 = vector.extract_strided_slice %5 {offsets = [3, 0], sizes = [1, 256], strides = [1, 1]} : vector<4x256xf32> to vector<1x256xf32>
    %c0_8 = arith.constant 0 : index
    %c0_9 = arith.constant 0 : index
    %c0_10 = arith.constant 0 : index
    %10 = vector.load %arg2[%c0_8, %c0_9, %c0_10] : memref<1x16x768xbf16, #tpu.memory_space<vmem>>, vector<1x16x768xbf16>
    %11 = vector.shape_cast %10 : vector<1x16x768xbf16> to vector<16x768xbf16>
    %cst = arith.constant dense<0.000000e+00> : vector<16x256xf32>
    %12 = tpu.matmul %11, %1, %cst {dimension_numbers = #tpu.dot_dimension_numbers<[1], [0], [0], [1], [0, 0, 1, 1], [], []>} : vector<16x768xbf16>, vector<768x256xbf16>, vector<16x256xf32> -> vector<16x256xf32>
    %13 = vector.broadcast %6 : vector<1x256xf32> to vector<16x256xf32>
    %14 = arith.addf %12, %13 : vector<16x256xf32>
    %15 = arith.mulf %14, %14 : vector<16x256xf32>
    %16 = arith.mulf %14, %15 : vector<16x256xf32>
    %cst_11 = arith.constant 4.471500e-02 : f32
    %17 = vector.broadcast %cst_11 : f32 to vector<16x256xf32>
    %18 = arith.mulf %17, %16 : vector<16x256xf32>
    %19 = arith.addf %14, %18 : vector<16x256xf32>
    %cst_12 = arith.constant 0.797884583 : f32
    %20 = vector.broadcast %cst_12 : f32 to vector<16x256xf32>
    %21 = arith.mulf %20, %19 : vector<16x256xf32>
    %22 = math.tanh %21 : vector<16x256xf32>
    %cst_13 = arith.constant 1.000000e+00 : f32
    %23 = vector.broadcast %cst_13 : f32 to vector<16x256xf32>
    %24 = arith.addf %23, %22 : vector<16x256xf32>
    %cst_14 = arith.constant 5.000000e-01 : f32
    %25 = vector.broadcast %cst_14 : f32 to vector<16x256xf32>
    %26 = arith.mulf %25, %24 : vector<16x256xf32>
    %27 = arith.mulf %14, %26 : vector<16x256xf32>
    %28 = arith.truncf %27 : vector<16x256xf32> to vector<16x256xbf16>
    %cst_15 = arith.constant dense<0.000000e+00> : vector<16x256xf32>
    %29 = tpu.matmul %28, %3, %cst_15 {dimension_numbers = #tpu.dot_dimension_numbers<[1], [0], [0], [1], [0, 0, 1, 1], [], []>} : vector<16x256xbf16>, vector<256x256xbf16>, vector<16x256xf32> -> vector<16x256xf32>
    %30 = vector.broadcast %7 : vector<1x256xf32> to vector<16x256xf32>
    %31 = arith.addf %29, %30 : vector<16x256xf32>
    %32 = arith.addf %31, %14 : vector<16x256xf32>
    %cst_16 = arith.constant dense<0.000000e+00> : vector<16xf32>
    %33 = vector.multi_reduction <add>, %32, %cst_16 [1] : vector<16x256xf32> to vector<16xf32>
    %34 = vector.shape_cast %33 : vector<16xf32> to vector<16x1xf32>
    %cst_17 = arith.constant 2.560000e+02 : f32
    %35 = vector.broadcast %cst_17 : f32 to vector<16x1xf32>
    %36 = arith.divf %34, %35 : vector<16x1xf32>
    %37 = vector.broadcast %36 : vector<16x1xf32> to vector<16x256xf32>
    %38 = arith.subf %32, %37 : vector<16x256xf32>
    %39 = arith.mulf %38, %38 : vector<16x256xf32>
    %cst_18 = arith.constant dense<0.000000e+00> : vector<16xf32>
    %40 = vector.multi_reduction <add>, %39, %cst_18 [1] : vector<16x256xf32> to vector<16xf32>
    %41 = vector.shape_cast %40 : vector<16xf32> to vector<16x1xf32>
    %cst_19 = arith.constant 2.560000e+02 : f32
    %42 = vector.broadcast %cst_19 : f32 to vector<16x1xf32>
    %43 = arith.divf %41, %42 : vector<16x1xf32>
    %cst_20 = arith.constant 9.99999974E-6 : f32
    %44 = vector.broadcast %cst_20 : f32 to vector<16x1xf32>
    %45 = arith.addf %43, %44 : vector<16x1xf32>
    %46 = math.rsqrt %45 : vector<16x1xf32>
    %47 = vector.broadcast %46 : vector<16x1xf32> to vector<16x256xf32>
    %48 = arith.mulf %38, %47 : vector<16x256xf32>
    %49 = vector.broadcast %8 : vector<1x256xf32> to vector<16x256xf32>
    %50 = arith.mulf %48, %49 : vector<16x256xf32>
    %51 = vector.broadcast %9 : vector<1x256xf32> to vector<16x256xf32>
    %52 = arith.addf %50, %51 : vector<16x256xf32>
    %53 = arith.mulf %52, %52 : vector<16x256xf32>
    %cst_21 = arith.constant dense<0.000000e+00> : vector<16xf32>
    %54 = vector.multi_reduction <add>, %53, %cst_21 [1] : vector<16x256xf32> to vector<16xf32>
    %55 = vector.shape_cast %54 : vector<16xf32> to vector<16x1xf32>
    %cst_22 = arith.constant 1.000000e-24 : f32
    %56 = vector.broadcast %cst_22 : f32 to vector<16x1xf32>
    %57 = arith.maximumf %55, %56 : vector<16x1xf32>
    %58 = math.rsqrt %57 : vector<16x1xf32>
    %59 = vector.broadcast %58 : vector<16x1xf32> to vector<16x256xf32>
    %60 = arith.mulf %52, %59 : vector<16x256xf32>
    %c0_23 = arith.constant 0 : index
    %c0_24 = arith.constant 0 : index
    %c0_25 = arith.constant 0 : index
    %61 = vector.load %arg6[%c0_23, %c0_24, %c0_25] : memref<1x16x256xf32, #tpu.memory_space<vmem>>, vector<1x16x256xf32>
    %62 = vector.shape_cast %61 : vector<1x16x256xf32> to vector<16x256xf32>
    %63 = vector.shape_cast %60 : vector<16x256xf32> to vector<1x16x256xf32>
    tpu.vector_store %arg6[%c0_23, %c0_24, %c0_25], %63 {strides = array<i32>} : memref<1x16x256xf32, #tpu.memory_space<vmem>>, vector<1x16x256xf32>,
    return
  }
  func.func @transform_0(%arg0: i32, %arg1: i32) -> (i32, i32, i32) {
    %c0_i32 = arith.constant 0 : i32
    %c0_i32_0 = arith.constant 0 : i32
    return %arg0, %arg1, %c0_i32 : i32, i32, i32
  }
  func.func @transform_1(%arg0: i32, %arg1: i32) -> (i32, i32, i32) {
    %c0_i32 = arith.constant 0 : i32
    %c0_i32_0 = arith.constant 0 : i32
    %c0_i32_1 = arith.constant 0 : i32
    return %arg0, %c0_i32, %c0_i32_0 : i32, i32, i32
  }
  func.func @transform_2(%arg0: i32, %arg1: i32) -> (i32, i32, i32) {
    %c0_i32 = arith.constant 0 : i32
    %c0_i32_0 = arith.constant 0 : i32
    %c0_i32_1 = arith.constant 0 : i32
    return %arg0, %c0_i32, %c0_i32_0 : i32, i32, i32
  }
  func.func @transform_3(%arg0: i32, %arg1: i32) -> (i32, i32, i32) {
    %c0_i32 = arith.constant 0 : i32
    %c0_i32_0 = arith.constant 0 : i32
    %c0_i32_1 = arith.constant 0 : i32
    return %arg0, %c0_i32, %c0_i32_0 : i32, i32, i32
  }
  func.func @transform_4(%arg0: i32, %arg1: i32) -> (i32, i32, i32) {
    %c0_i32 = arith.constant 0 : i32
    %c0_i32_0 = arith.constant 0 : i32
    return %arg0, %arg1, %c0_i32 : i32, i32, i32
  }
}

</mosaic_0001>

<bundles_post_ra>
// kernel: clip_plus_vit_forward.1
= control target key start
LH: loop header
LB: loop body
LE: loop exit
PB: predicated region body
PF: predicated region fallthrough
CT: control target
= control target key end

     0   :  { %s2045_s15 = smov 0   ;;  %s2047_s16 = smov 0   ;;  %s2270_s0 = inlined_call_operand.vmem [shape: bf16[2,16,768], index: 0, kind: input, shape index: {}]   ;;  %s2271_s1 = inlined_call_operand.vmem [shape: bf16[2,768,256], index: 1, kind: input, shape index: {}]   ;;  %s2272_s2 = inlined_call_operand.vmem [shape: bf16[2,256,256], index: 2, kind: input, shape index: {}]   ;;  %s2273_s3 = inlined_call_operand.vmem [shape: f32[2,4,256], index: 3, kind: input, shape index: {}]   ;;  %s2274_s4 = inlined_call_operand.vmem [shape: f32[2,16,256], index: 4, kind: output, shape index: {}]  }
   0x1   :  { %s2049_s17 = smov 0  }
   0x2 LB: > { %s26_s18 = sadd.s32 1, %s2014_s16  ;;  %p1593_p0 = scmp.ge.s32.totalorder %s2018_s17, 1  ;;  %s2018_s17 = sphi %s2049_s17, %s14_s17   ;;  %s2014_s16 = sphi %s2047_s16, %s2276_s16   ;;  %s2010_s15 = sphi %s2045_s15, %s2275_s15  }
   0x3   : > { %p28_p1 = scmp.ge.s32.totalorder %s26_s18, 2  ;;  %p214_p2 = scmp.lt.s32.totalorder %s2018_s17, 3 }
   0x5   : > { %s2278_s18 = smov (%p28_p1, %s26_s18), 0  ;;  %p215_p3 = pnand %p1593_p0, %p214_p2 }
   0x6   : > { %p266_p4 = scmp.lt.s32.totalorder (!%p215_p3), %s2010_s15, 1 }
   0x7   : > { %218 = sbr.rel (%p215_p3) target bundleno = 1092 (0x444), region = 36 }
   0xe   : > { %s2280_s15 = smov (!%p266_p4, %s2010_s15), 1 }
   0xf   : > { %s1754_s19 = smul.u32 768, %s2280_s15  ;;  %s1738_s27 = sshll.u32 %s2280_s15, 8 }
  0x10   : > { %s1753_s23 = smul.u32 48, %s2280_s15  ;;  %s2148_s30 = scalar_lea.vmem %s2272_s2, %s1738_s27 }
  0x11   : > { %s2069_s22 = scalar_lea.vmem %s2271_s1, %s1754_s19  ;;  %s1739_s5 = sshll.u32 %s2280_s15, 3 }
  0x12   : > { %v1779_v0 = vld [vmem:[%s2069_s22 + $0x104] ss:$8 sps:$4 sm:$0xff]   ;;  %v1781_v1 = vld [vmem:[%s2069_s22 + $0x100] ss:$8 sps:$4 sm:$0xff]   ;;  %v1782_v2 = vld [vmem:[%s2069_s22 + $0x114] ss:$8 sps:$4 sm:$0xff]   ;;  %s2091_s26 = scalar_lea.vmem %s2270_s0, %s1753_s23  ;;  %s290_s8 = scalar_lea.vmem %s2273_s3, %s1739_s5 }
  0x13   : > { %1009 = vmatprep.subr.bf16.mxu0 %v1779_v0  ;;  %v1784_v3 = vld [vmem:[%s2069_s22 + $0x110] ss:$8 sps:$4 sm:$0xff]   ;;  %v1785_v4 = vld [vmem:[%s2069_s22 + $0x124] ss:$8 sps:$4 sm:$0xff]   ;;  %v1787_v5 = vld [vmem:[%s2069_s22 + $0x120] ss:$8 sps:$4 sm:$0xff]  }
  0x14   : > { %1010 = vmatpush1.bf16.msra.mxu0 %v1781_v1  ;;  %v1788_v6 = vld [vmem:[%s2069_s22 + $0x134] ss:$8 sps:$4 sm:$0xff]   ;;  %v1790_v7 = vld [vmem:[%s2069_s22 + $0x130] ss:$8 sps:$4 sm:$0xff]   ;;  %v1791_v8 = vld [vmem:[%s2069_s22 + $0x144] ss:$8 sps:$4 sm:$0xff]  }
  0x15   : > { %1011 = vmatprep.subr.bf16.mxu0 %v1782_v2  ;;  %v1793_v9 = vld [vmem:[%s2069_s22 + $0x140] ss:$8 sps:$4 sm:$0xff]   ;;  %v1794_v10 = vld [vmem:[%s2069_s22 + $0x154] ss:$8 sps:$4 sm:$0xff]   ;;  %v1796_v11 = vld [vmem:[%s2069_s22 + $0x150] ss:$8 sps:$4 sm:$0xff]  }
  0x16   : > { %v1797_v12 = vld [vmem:[%s2069_s22 + $0x164] ss:$8 sps:$4 sm:$0xff]   ;;  %v1826_v14 = vld [vmem:[%s2069_s22] ss:$8 sps:$4 sm:$0xff]   ;;  %v1830_v16 = vld [vmem:[%s2069_s22 + $0x14] ss:$8 sps:$4 sm:$0xff]  }
  0x17   : > { %v1824_v13 = vld [vmem:[%s2069_s22 + $0x4] ss:$8 sps:$4 sm:$0xff]   ;;  %v1799_v15 = vld [vmem:[%s2069_s22 + $0x160] ss:$8 sps:$4 sm:$0xff]   ;;  %v1832_v17 = vld [vmem:[%s2069_s22 + $0x10] ss:$8 sps:$4 sm:$0xff]  }
  0x18   : > { %1012 = vmatpush1.bf16.msra.mxu0 %v1784_v3  ;;  %966 = vmatprep.subr.bf16.mxu1 %v1824_v13  ;;  %v1800_v18 = vld [vmem:[%s2069_s22 + $0x174] ss:$8 sps:$4 sm:$0xff]   ;;  %v1835_v19 = vld [vmem:[%s2091_s26 + $0xc] ss:$24 sps:$4 sm:$0xff]   ;;  %v1802_v20 = vld [vmem:[%s2069_s22 + $0x170] ss:$8 sps:$4 sm:$0xff]  }
  0x19   : > { %1013 = vmatprep.subr.bf16.mxu0 %v1785_v4  ;;  %967 = vmatpush1.bf16.msra.mxu1 %v1826_v14  ;;  %v1839_v21 = vld [vmem:[%s2069_s22 + $0x24] ss:$8 sps:$4 sm:$0xff]   ;;  %v1841_v22 = vld [vmem:[%s2069_s22 + $0x20] ss:$8 sps:$4 sm:$0xff]   ;;  %v1845_v25 = vld [vmem:[%s2069_s22 + $0x34] ss:$8 sps:$4 sm:$0xff]  }
  0x1a   : > { %968 = vmatprep.subr.bf16.mxu1 %v1830_v16  ;;  %v1803_v23 = vld [vmem:[%s2069_s22 + $0x184] ss:$8 sps:$4 sm:$0xff]   ;;  %1041 = vmatprep.mubr.bf16.mxu0 %v1835_v19  ;;  %v1805_v24 = vld [vmem:[%s2069_s22 + $0x180] ss:$8 sps:$4 sm:$0xff]   ;;  %v1806_v26 = vld [vmem:[%s2069_s22 + $0x194] ss:$8 sps:$4 sm:$0xff]  }
  0x1b   : > { %v1847_v27 = vld [vmem:[%s2069_s22 + $0x30] ss:$8 sps:$4 sm:$0xff]   ;;  %v1851_v28 = vld [vmem:[%s2069_s22 + $0x44] ss:$8 sps:$4 sm:$0xff]   ;;  %v1853_v31 = vld [vmem:[%s2069_s22 + $0x40] ss:$8 sps:$4 sm:$0xff]  }
  0x1c   : > { %1014 = vmatpush1.bf16.msra.mxu0 %v1787_v5  ;;  %v1808_v29 = vld [vmem:[%s2069_s22 + $0x190] ss:$8 sps:$4 sm:$0xff]   ;;  %v1809_v30 = vld [vmem:[%s2069_s22 + $0x1a4] ss:$8 sps:$4 sm:$0xff]   ;;  %v1857_v32 = vld [vmem:[%s2069_s22 + $0x54] ss:$8 sps:$4 sm:$0xff]  }
  0x1d   : > { %1015 = vmatprep.subr.bf16.mxu0 %v1788_v6  ;;  %969 = vmatpush1.bf16.msra.mxu1 %v1832_v17  ;;  %v1811_v33 = vld [vmem:[%s2069_s22 + $0x1a0] ss:$8 sps:$4 sm:$0xff]   ;;  %v1812_v34 = vld [vmem:[%s2069_s22 + $0x1b4] ss:$8 sps:$4 sm:$0xff]   ;;  %v1859_v35 = vld [vmem:[%s2069_s22 + $0x50] ss:$8 sps:$4 sm:$0xff]  }
  0x1e   : > { %970 = vmatprep.subr.bf16.mxu1 %v1839_v21  ;;  %v1863_v36 = vld [vmem:[%s2069_s22 + $0x64] ss:$8 sps:$4 sm:$0xff]   ;;  %v1814_v37 = vld [vmem:[%s2069_s22 + $0x1b0] ss:$8 sps:$4 sm:$0xff]   ;;  %v1865_v39 = vld [vmem:[%s2069_s22 + $0x60] ss:$8 sps:$4 sm:$0xff]  }
  0x1f   : > { %v1815_v38 = vld [vmem:[%s2069_s22 + $0x1c4] ss:$8 sps:$4 sm:$0xff]   ;;  %v1869_v40 = vld [vmem:[%s2069_s22 + $0x74] ss:$8 sps:$4 sm:$0xff]   ;;  %v1817_v41 = vld [vmem:[%s2069_s22 + $0x1c0] ss:$8 sps:$4 sm:$0xff]  }
  0x20   : > { %1016 = vmatpush1.bf16.msra.mxu0 %v1790_v7  ;;  %v1818_v42 = vld [vmem:[%s2069_s22 + $0x1d4] ss:$8 sps:$4 sm:$0xff]   ;;  %v1871_v43 = vld [vmem:[%s2069_s22 + $0x70] ss:$8 sps:$4 sm:$0xff]   ;;  %v1875_v44 = vld [vmem:[%s2069_s22 + $0x84] ss:$8 sps:$4 sm:$0xff]  }
  0x21   : > { %1017 = vmatprep.subr.bf16.mxu0 %v1791_v8  ;;  %971 = vmatpush1.bf16.msra.mxu1 %v1841_v22  ;;  %v1820_v45 = vld [vmem:[%s2069_s22 + $0x1d0] ss:$8 sps:$4 sm:$0xff]   ;;  %v1821_v46 = vld [vmem:[%s2069_s22 + $0x1e4] ss:$8 sps:$4 sm:$0xff]   ;;  %v1877_v47 = vld [vmem:[%s2069_s22 + $0x80] ss:$8 sps:$4 sm:$0xff]  }
  0x22   : > { %972 = vmatprep.subr.bf16.mxu1 %v1845_v25  ;;  %v1881_v48 = vld [vmem:[%s2069_s22 + $0x94] ss:$8 sps:$4 sm:$0xff]   ;;  %v1823_v49 = vld [vmem:[%s2069_s22 + $0x1e0] ss:$8 sps:$4 sm:$0xff]   ;;  %v1883_v51 = vld [vmem:[%s2069_s22 + $0x90] ss:$8 sps:$4 sm:$0xff]  }
  0x23   : > { %v1827_v50 = vld [vmem:[%s2069_s22 + $0x1f4] ss:$8 sps:$4 sm:$0xff]   ;;  %v1887_v52 = vld [vmem:[%s2069_s22 + $0xa4] ss:$8 sps:$4 sm:$0xff]   ;;  %v1829_v53 = vld [vmem:[%s2069_s22 + $0x1f0] ss:$8 sps:$4 sm:$0xff]  }
  0x24   : > { %1018 = vmatpush1.bf16.msra.mxu0 %v1793_v9  ;;  %v1838_v54 = vld [vmem:[%s2069_s22 + $0x204] ss:$8 sps:$4 sm:$0xff]   ;;  %v1889_v55 = vld [vmem:[%s2069_s22 + $0xa0] ss:$8 sps:$4 sm:$0xff]   ;;  %v1893_v56 = vld [vmem:[%s2069_s22 + $0xb4] ss:$8 sps:$4 sm:$0xff]  }
  0x25   : > { %1019 = vmatprep.subr.bf16.mxu0 %v1794_v10  ;;  %973 = vmatpush1.bf16.msra.mxu1 %v1847_v27  ;;  %v1833_v57 = vld [vmem:[%s2091_s26 + $0x8] ss:$24 sps:$4 sm:$0xff]   ;;  %v1844_v59 = vld [vmem:[%s2069_s22 + $0x214] ss:$8 sps:$4 sm:$0xff]   ;;  %v1895_v60 = vld [vmem:[%s2069_s22 + $0xb0] ss:$8 sps:$4 sm:$0xff]  }
  0x26   : > { %974 = vmatprep.subr.bf16.mxu1 %v1851_v28  ;;  %v1836_v58 = vld [vmem:[%s2069_s22 + $0x200] ss:$8 sps:$4 sm:$0xff]   ;;  %v1899_v61 = vld [vmem:[%s2069_s22 + $0xc4] ss:$8 sps:$4 sm:$0xff]   ;;  %v1842_v63 = vld [vmem:[%s2069_s22 + $0x210] ss:$8 sps:$4 sm:$0xff]  }
  0x27   : > { %v1925_v62 = vld [vmem:[%s2091_s26 + $0x4] ss:$24 sps:$4 sm:$0xff]   ;;  %v1901_v1 = vld [vmem:[%s2069_s22 + $0xc0] ss:$8 sps:$4 sm:$0xff]   ;;  %v1931_v2 = vld [vmem:[%s2091_s26 + $0x14] ss:$24 sps:$4 sm:$0xff]  }
  0x28   : > { %1020 = vmatpush1.bf16.msra.mxu0 %v1796_v11  ;;  %v1850_v0 = vld [vmem:[%s2069_s22 + $0x224] ss:$8 sps:$4 sm:$0xff]   ;;  %v1905_v3 = vld [vmem:[%s2069_s22 + $0xd4] ss:$8 sps:$4 sm:$0xff]   ;;  %998 = vmatprep.mubr.bf16.mxu1 %v1925_v62  ;;  %v1848_v4 = vld [vmem:[%s2069_s22 + $0x220] ss:$8 sps:$4 sm:$0xff]  }
  0x29   : > { %1021 = vmatprep.subr.bf16.mxu0 %v1797_v12  ;;  %975 = vmatpush1.bf16.msra.mxu1 %v1853_v31  ;;  %v1856_v5 = vld [vmem:[%s2069_s22 + $0x234] ss:$8 sps:$4 sm:$0xff]   ;;  %v1907_v6 = vld [vmem:[%s2069_s22 + $0xd0] ss:$8 sps:$4 sm:$0xff]   ;;  %v1911_v7 = vld [vmem:[%s2069_s22 + $0xe4] ss:$8 sps:$4 sm:$0xff]  }
  0x2a   : > { %976 = vmatprep.subr.bf16.mxu1 %v1857_v32  ;;  %v1854_v8 = vld [vmem:[%s2069_s22 + $0x230] ss:$8 sps:$4 sm:$0xff]   ;;  %v1862_v9 = vld [vmem:[%s2069_s22 + $0x244] ss:$8 sps:$4 sm:$0xff]   ;;  %v1913_v10 = vld [vmem:[%s2069_s22 + $0xe0] ss:$8 sps:$4 sm:$0xff]  }
  0x2b   : > { %v1917_v11 = vld [vmem:[%s2069_s22 + $0xf4] ss:$8 sps:$4 sm:$0xff]   ;;  %v1860_v12 = vld [vmem:[%s2069_s22 + $0x240] ss:$8 sps:$4 sm:$0xff]   ;;  %v1919_v13 = vld [vmem:[%s2069_s22 + $0xf0] ss:$8 sps:$4 sm:$0xff]  }
  0x2c   : > { %1022 = vmatpush1.bf16.msra.mxu0 %v1799_v15  ;;  %v1868_v14 = vld [vmem:[%s2069_s22 + $0x254] ss:$8 sps:$4 sm:$0xff]   ;;  %v1934_v15 = vld [vmem:[%s2148_s30 + $0x4] ss:$8 sps:$4 sm:$0xff]   ;;  %v1923_v16 = vld [vmem:[%s2091_s26] ss:$24 sps:$4 sm:$0xff]  }
  0x2d   : > { %1023 = vmatprep.subr.bf16.mxu0 %v1800_v18  ;;  %977 = vmatpush1.bf16.msra.mxu1 %v1859_v35  ;;  %v1866_v17 = vld [vmem:[%s2069_s22 + $0x250] ss:$8 sps:$4 sm:$0xff]   ;;  %v1932_v18 = vld [vmem:[%s2148_s30] ss:$8 sps:$4 sm:$0xff]   ;;  %v1874_v19 = vld [vmem:[%s2069_s22 + $0x264] ss:$8 sps:$4 sm:$0xff]  }
  0x2e   : > { %978 = vmatprep.subr.bf16.mxu1 %v1863_v36  ;;  %v1872_v21 = vld [vmem:[%s2069_s22 + $0x260] ss:$8 sps:$4 sm:$0xff]   ;;  %v1935_v22 = vld [vmem:[%s2148_s30 + $0x10] ss:$8 sps:$4 sm:$0xff]   ;;  %v1886_v27 = vld [vmem:[%s2069_s22 + $0x284] ss:$8 sps:$4 sm:$0xff]  }
  0x2f   : > { %v1878_v25 = vld [vmem:[%s2069_s22 + $0x270] ss:$8 sps:$4 sm:$0xff]   ;;  %v1943_v28 = vld [vmem:[%s2148_s30 + $0x34] ss:$8 sps:$4 sm:$0xff]   ;;  %v1946_v32 = vld [vmem:[%s2148_s30 + $0x44] ss:$8 sps:$4 sm:$0xff]  }
  0x30   : > { %1024 = vmatpush1.bf16.msra.mxu0 %v1802_v20  ;;  %v1937_v20 = vld [vmem:[%s2148_s30 + $0x14] ss:$8 sps:$4 sm:$0xff]   ;;  %v1898_v35 = vld [vmem:[%s2069_s22 + $0x2a4] ss:$8 sps:$4 sm:$0xff]   ;;  %s1740_s9 = sshll.u32 %s2280_s15, 5 }
  0x31   : > { %1025 = vmatprep.subr.bf16.mxu0 %v1803_v23  ;;  %979 = vmatpush1.bf16.msra.mxu1 %v1865_v39  ;;  %v1880_v23 = vld [vmem:[%s2069_s22 + $0x274] ss:$8 sps:$4 sm:$0xff]   ;;  %v1970_v62 = vld [vmem:[%s2148_s30 + $0xc4] ss:$8 sps:$4 sm:$0xff]   ;;  %s300_s12 = scalar_lea.vmem %s2274_s4, %s1740_s9 }
  0x32   : > { %980 = vmatprep.subr.bf16.mxu1 %v1869_v40  ;;  %v1892_v31 = vld [vmem:[%s2069_s22 + $0x294] ss:$8 sps:$4 sm:$0xff]   ;;  %v1902_v40 = vld [vmem:[%s2069_s22 + $0x2b0] ss:$8 sps:$4 sm:$0xff]  }
  0x33   : > { %v1949_v36 = vld [vmem:[%s2148_s30 + $0x54] ss:$8 sps:$4 sm:$0xff]  }
  0x34   : > { %1026 = vmatpush1.bf16.msra.mxu0 %v1805_v24  ;;  %v1940_v24 = vld [vmem:[%s2148_s30 + $0x24] ss:$8 sps:$4 sm:$0xff]   ;;  %v1904_v39 = vld [vmem:[%s2069_s22 + $0x2b4] ss:$8 sps:$4 sm:$0xff]  }
  0x35   : > { %1027 = vmatprep.subr.bf16.mxu0 %v1806_v26  ;;  %981 = vmatpush1.bf16.msra.mxu1 %v1871_v43  ;;  %v1938_v26 = vld [vmem:[%s2148_s30 + $0x20] ss:$8 sps:$4 sm:$0xff]   ;;  %v1916_v43 = vld [vmem:[%s2069_s22 + $0x2d4] ss:$8 sps:$4 sm:$0xff]  }
  0x36   : > { %982 = vmatprep.subr.bf16.mxu1 %v1875_v44  ;;  %v1914_v44 = vld [vmem:[%s2069_s22 + $0x2d0] ss:$8 sps:$4 sm:$0xff]  }
  0x38   : > { %1028 = vmatpush1.bf16.msra.mxu0 %v1808_v29  ;;  %v1884_v29 = vld [vmem:[%s2069_s22 + $0x280] ss:$8 sps:$4 sm:$0xff]  }
  0x39   : > { %1029 = vmatprep.subr.bf16.mxu0 %v1809_v30  ;;  %983 = vmatpush1.bf16.msra.mxu1 %v1877_v47  ;;  %v1941_v30 = vld [vmem:[%s2148_s30 + $0x30] ss:$8 sps:$4 sm:$0xff]   ;;  %v1928_v47 = vld [vmem:[%s2069_s22 + $0x2f4] ss:$8 sps:$4 sm:$0xff]  }
  0x3a   : > { %984 = vmatprep.subr.bf16.mxu1 %v1881_v48  ;;  %v1926_v48 = vld [vmem:[%s2069_s22 + $0x2f0] ss:$8 sps:$4 sm:$0xff]  }
  0x3c   : > { %1030 = vmatpush1.bf16.msra.mxu0 %v1811_v33  ;;  %v1890_v33 = vld [vmem:[%s2069_s22 + $0x290] ss:$8 sps:$4 sm:$0xff]  }
  0x3d   : > { %1031 = vmatprep.subr.bf16.mxu0 %v1812_v34  ;;  %985 = vmatpush1.bf16.msra.mxu1 %v1883_v51  ;;  %v1944_v34 = vld [vmem:[%s2148_s30 + $0x40] ss:$8 sps:$4 sm:$0xff]   ;;  %v1952_v51 = vld [vmem:[%s2148_s30 + $0x64] ss:$8 sps:$4 sm:$0xff]  }
  0x3e   : > { %986 = vmatprep.subr.bf16.mxu1 %v1887_v52  ;;  %v1955_v52 = vld [vmem:[%s2148_s30 + $0x74] ss:$8 sps:$4 sm:$0xff]  }
  0x40   : > { %1032 = vmatpush1.bf16.msra.mxu0 %v1814_v37  ;;  %v1896_v37 = vld [vmem:[%s2069_s22 + $0x2a0] ss:$8 sps:$4 sm:$0xff]  }
  0x41   : > { %1033 = vmatprep.subr.bf16.mxu0 %v1815_v38  ;;  %987 = vmatpush1.bf16.msra.mxu1 %v1889_v55  ;;  %v1947_v38 = vld [vmem:[%s2148_s30 + $0x50] ss:$8 sps:$4 sm:$0xff]   ;;  %v1956_v55 = vld [vmem:[%s2148_s30 + $0x80] ss:$8 sps:$4 sm:$0xff]  }
  0x42   : > { %988 = vmatprep.subr.bf16.mxu1 %v1893_v56  ;;  %v1961_v56 = vld [vmem:[%s2148_s30 + $0x94] ss:$8 sps:$4 sm:$0xff]  }
  0x44   : > { %1034 = vmatpush1.bf16.msra.mxu0 %v1817_v41  ;;  %v1910_v41 = vld [vmem:[%s2069_s22 + $0x2c4] ss:$8 sps:$4 sm:$0xff]  }
  0x45   : > { %1035 = vmatprep.subr.bf16.mxu0 %v1818_v42  ;;  %989 = vmatpush1.bf16.msra.mxu1 %v1895_v60  ;;  %v1908_v42 = vld [vmem:[%s2069_s22 + $0x2c0] ss:$8 sps:$4 sm:$0xff]   ;;  %v1967_v60 = vld [vmem:[%s2148_s30 + $0xb4] ss:$8 sps:$4 sm:$0xff]  }
  0x46   : > { %990 = vmatprep.subr.bf16.mxu1 %v1899_v61  ;;  %v1965_v61 = vld [vmem:[%s2148_s30 + $0xb0] ss:$8 sps:$4 sm:$0xff]  }
  0x48   : > { %1036 = vmatpush1.bf16.msra.mxu0 %v1820_v45  ;;  %v1922_v45 = vld [vmem:[%s2069_s22 + $0x2e4] ss:$8 sps:$4 sm:$0xff]  }
  0x49   : > { %1037 = vmatprep.subr.bf16.mxu0 %v1821_v46  ;;  %991 = vmatpush1.bf16.msra.mxu1 %v1901_v1  ;;  %v1920_v46 = vld [vmem:[%s2069_s22 + $0x2e0] ss:$8 sps:$4 sm:$0xff]   ;;  %v1971_v1 = vld [vmem:[%s2148_s30 + $0xd0] ss:$8 sps:$4 sm:$0xff]  }
  0x4a   : > { %992 = vmatprep.subr.bf16.mxu1 %v1905_v3  ;;  %v1974_v3 = vld [vmem:[%s2148_s30 + $0xe0] ss:$8 sps:$4 sm:$0xff]  }
  0x4c   : > { %1038 = vmatpush1.bf16.msra.mxu0 %v1823_v49  ;;  %v1929_v49 = vld [vmem:[%s2091_s26 + $0x10] ss:$24 sps:$4 sm:$0xff]  }
  0x4d   : > { %1039 = vmatprep.subr.bf16.mxu0 %v1827_v50  ;;  %993 = vmatpush1.bf16.msra.mxu1 %v1907_v6  ;;  %v1950_v50 = vld [vmem:[%s2148_s30 + $0x60] ss:$8 sps:$4 sm:$0xff]  }
  0x4e   : > { %994 = vmatprep.subr.bf16.mxu1 %v1911_v7 }
  0x50   : > { %1040 = vmatpush1.bf16.msra.mxu0 %v1829_v53  ;;  %v1953_v53 = vld [vmem:[%s2148_s30 + $0x70] ss:$8 sps:$4 sm:$0xff]  }
  0x51   : > { %1052 = vmatprep.subr.bf16.mxu0 %v1838_v54  ;;  %995 = vmatpush1.bf16.msra.mxu1 %v1913_v10  ;;  %v1958_v54 = vld [vmem:[%s2148_s30 + $0x84] ss:$8 sps:$4 sm:$0xff]   ;;  %v438_v10 = vlaneseq }
  0x52   : > { %996 = vmatprep.subr.bf16.mxu1 %v1917_v11 }
  0x53   : > { %1042 = vmatmul.mubr.bf16.vlgmr.msra.gmra.mrb[0].mxu0 %v1833_v57  ;;  %v1959_v57 = vld [vmem:[%s2148_s30 + $0x90] ss:$8 sps:$4 sm:$0xff]   ;;  %v2218_v11 = vshrl.u32 %v438_v10, 7 }
  0x54   : > { %1053 = vmatpush1.bf16.msra.mxu0 %v1836_v58  ;;  %1084 = vmatprep.mubr.bf16.mxu0 %v1931_v2  ;;  %v1964_v58 = vld [vmem:[%s2148_s30 + $0xa4] ss:$8 sps:$4 sm:$0xff]  }
  0x55   : > { %1054 = vmatprep.subr.bf16.mxu0 %v1844_v59  ;;  %997 = vmatpush1.bf16.msra.mxu1 %v1919_v13  ;;  %v1962_v59 = vld [vmem:[%s2148_s30 + $0xa0] ss:$8 sps:$4 sm:$0xff]   ;;  %v1976_v2 = vld [vmem:[%s2148_s30 + $0xe4] ss:$8 sps:$4 sm:$0xff]  }
  0x56   : > { %1311 = vmatprep.subr.bf16.mxu1 %v1934_v15  ;;  %v2224_v13 = vld [vmem:[%s290_s8] sm:$0xff] }
  0x58   : > { %1055 = vmatpush1.bf16.msra.mxu0 %v1842_v63  ;;  %999 = vmatmul.mubr.bf16.vlgmr.msra.gmra.mrb[0].mxu1 %v1923_v16  ;;  %v1968_v63 = vld [vmem:[%s2148_s30 + $0xc0] ss:$8 sps:$4 sm:$0xff]  }
  0x59   : > { %1056 = vmatprep.subr.bf16.mxu0 %v1850_v0  ;;  %1312 = vmatpush1.bf16.msra.mxu1 %v1932_v18  ;;  %v1973_v0 = vld [vmem:[%s2148_s30 + $0xd4] ss:$8 sps:$4 sm:$0xff]  }
  0x5a   : > { %1313 = vmatprep.subr.bf16.mxu1 %v1937_v20 }
  0x5c   : > { %1057 = vmatpush1.bf16.msra.mxu0 %v1848_v4  ;;  %v1979_v4 = vld [vmem:[%s2148_s30 + $0xf4] ss:$8 sps:$4 sm:$0xff]  }
  0x5d   : > { %1058 = vmatprep.subr.bf16.mxu0 %v1856_v5  ;;  %1314 = vmatpush1.bf16.msra.mxu1 %v1935_v22  ;;  %v1977_v5 = vld [vmem:[%s2148_s30 + $0xf0] ss:$8 sps:$4 sm:$0xff]  }
  0x5e   : > { %1315 = vmatprep.subr.bf16.mxu1 %v1940_v24 }
  0x60   : > { %1059 = vmatpush1.bf16.msra.mxu0 %v1854_v8 }
  0x61   : > { %1060 = vmatprep.subr.bf16.mxu0 %v1862_v9  ;;  %1316 = vmatpush1.bf16.msra.mxu1 %v1938_v26 }
  0x62   : > { %1317 = vmatprep.subr.bf16.mxu1 %v1943_v28 }
  0x64   : > { %1061 = vmatpush1.bf16.msra.mxu0 %v1860_v12  ;;  %v440_v12 = vsub.s32 0, %v2218_v11 }
  0x65   : > { %1062 = vmatprep.subr.bf16.mxu0 %v1868_v14  ;;  %1318 = vmatpush1.bf16.msra.mxu1 %v1941_v30  ;;  %v444_v14 = vsub.s32 4, %v2218_v11 }
  0x66   : > { %1319 = vmatprep.subr.bf16.mxu1 %v1946_v32  ;;  %v441_v15 = vrot.slane %v2224_v13, %v440_v12 }
  0x67   : > { %v445_v16 = vrot.slane %v2224_v13, %v444_v14 }
  0x68   : > { %1063 = vmatpush1.bf16.msra.mxu0 %v1866_v17  ;;  %v451_v17 = vrot.slane %v441_v15, %v440_v12 }
  0x69   : > { %1064 = vmatprep.subr.bf16.mxu0 %v1874_v19  ;;  %1320 = vmatpush1.bf16.msra.mxu1 %v1944_v34  ;;  %v455_v18 = vrot.slane %v445_v16, %v440_v12 }
  0x6a   : > { %1321 = vmatprep.subr.bf16.mxu1 %v1949_v36 }
  0x6c   : > { %1065 = vmatpush1.bf16.msra.mxu0 %v1872_v21 }
  0x6d   : > { %1066 = vmatprep.subr.bf16.mxu0 %v1880_v23  ;;  %1322 = vmatpush1.bf16.msra.mxu1 %v1947_v38 }
  0x6e   : > { %1323 = vmatprep.subr.bf16.mxu1 %v1952_v51 }
  0x70   : > { %1067 = vmatpush1.bf16.msra.mxu0 %v1878_v25 }
  0x71   : > { %1068 = vmatprep.subr.bf16.mxu0 %v1886_v27  ;;  %1324 = vmatpush1.bf16.msra.mxu1 %v1950_v50 }
  0x72   : > { %1325 = vmatprep.subr.bf16.mxu1 %v1955_v52 }
  0x74   : > { %1069 = vmatpush1.bf16.msra.mxu0 %v1884_v29 }
  0x75   : > { %1070 = vmatprep.subr.bf16.mxu0 %v1892_v31  ;;  %1326 = vmatpush1.bf16.msra.mxu1 %v1953_v53 }
  0x76   : > { %1327 = vmatprep.subr.bf16.mxu1 %v1958_v54 }
  0x78   : > { %1071 = vmatpush1.bf16.msra.mxu0 %v1890_v33 }
  0x79   : > { %1072 = vmatprep.subr.bf16.mxu0 %v1898_v35  ;;  %1328 = vmatpush1.bf16.msra.mxu1 %v1956_v55 }
  0x7a   : > { %1329 = vmatprep.subr.bf16.mxu1 %v1961_v56 }
  0x7c   : > { %1073 = vmatpush1.bf16.msra.mxu0 %v1896_v37 }
  0x7d   : > { %1074 = vmatprep.subr.bf16.mxu0 %v1904_v39  ;;  %1330 = vmatpush1.bf16.msra.mxu1 %v1959_v57 }
  0x7e   : > { %1331 = vmatprep.subr.bf16.mxu1 %v1964_v58 }
  0x80   : > { %1075 = vmatpush1.bf16.msra.mxu0 %v1902_v40 }
  0x81   : > { %1076 = vmatprep.subr.bf16.mxu0 %v1910_v41  ;;  %1332 = vmatpush1.bf16.msra.mxu1 %v1962_v59 }
  0x82   : > { %1333 = vmatprep.subr.bf16.mxu1 %v1967_v60 }
  0x84   : > { %1077 = vmatpush1.bf16.msra.mxu0 %v1908_v42 }
  0x85   : > { %1078 = vmatprep.subr.bf16.mxu0 %v1916_v43  ;;  %1334 = vmatpush1.bf16.msra.mxu1 %v1965_v61 }
  0x86   : > { %1335 = vmatprep.subr.bf16.mxu1 %v1970_v62 }
  0x88   : > { %1079 = vmatpush1.bf16.msra.mxu0 %v1914_v44 }
  0x89   : > { %1080 = vmatprep.subr.bf16.mxu0 %v1922_v45  ;;  %1336 = vmatpush1.bf16.msra.mxu1 %v1968_v63 }
  0x8a   : > { %1337 = vmatprep.subr.bf16.mxu1 %v1973_v0 }
  0x8c   : > { %1081 = vmatpush1.bf16.msra.mxu0 %v1920_v46 }
  0x8d   : > { %1082 = vmatprep.subr.bf16.mxu0 %v1928_v47  ;;  %1338 = vmatpush1.bf16.msra.mxu1 %v1971_v1 }
  0x8e   : > { %1339 = vmatprep.subr.bf16.mxu1 %v1976_v2 }
  0x90   : > { %1083 = vmatpush1.bf16.msra.mxu0 %v1926_v48 }
  0x91   : > { %1340 = vmatpush1.bf16.msra.mxu1 %v1974_v3 }
  0x92   : > { %1341 = vmatprep.subr.bf16.mxu1 %v1979_v4 }
  0x93   : > { %1085 = vmatmul.mubr.bf16.vlgmr.msra.gmra.mrb[0].mxu0 %v1929_v49 }
  0x95   : > { %1342 = vmatpush1.bf16.msra.mxu1 %v1977_v5  ;;  %v1135_v5 = vsub.s32 1, %v2218_v11 }
 0x12b   : > { %v1000_v6 = vpop.f32.mrb[0].mxu1 }
 0x12c   : > { %v1002_v7 = vpop.f32.mrb[1].mxu1  ;;  %v1001_v19 = vadd.f32 %v1000_v6, %v451_v17  ;;  %v1139_v6 = vsub.s32 5, %v2218_v11 }
 0x12d   : > { %v1004_v8 = vpop.f32.mrb[2].mxu1  ;;  %v1003_v20 = vadd.f32 %v1002_v7, %v455_v18  ;;  %v1136_v7 = vrot.slane %v2224_v13, %v1135_v5 }
 0x12e   : > { %v1006_v9 = vpop.f32.mrb[3].mxu1  ;;  %v1005_v22 = vadd.f32 %v1004_v8, %v451_v17  ;;  %v1140_v8 = vrot.slane %v2224_v13, %v1139_v6 }
 0x12f   : > { %v1007_v25 = vadd.f32 %v1006_v9, %v455_v18  ;;  %v1146_v9 = vrot.slane %v1136_v7, %v1135_v5 }
 0x130   : > { %v1150_v10 = vrot.slane %v1140_v8, %v1135_v5 }
 0x166   : > { %v1086_v21 = vpop.f32.mrb[0].mxu0 }
 0x167   : > { %v2229_v23 = vadd.f32 %v1086_v21, %v1001_v19  ;;  %v1088_v24 = vpop.f32.mrb[1].mxu0 }
 0x168   : > { %v2231_v26 = vadd.f32 %v1088_v24, %v1003_v20  ;;  %v1090_v27 = vpop.f32.mrb[2].mxu0 }
 0x169   : > { %v1095_v28 = vmul.f32 %v2229_v23, %v2229_v23  ;;  %v1746_v29 = vadd.f32 %v1090_v27, %v1005_v22  ;;  %v1092_v30 = vpop.f32.mrb[3].mxu0 }
 0x16a   : > { %v1096_v31 = vmul.f32 %v2231_v26, %v2231_v26  ;;  %v1748_v32 = vadd.f32 %v1092_v30, %v1007_v25 }
 0x16b   : > { %v1099_v33 = vmul.f32 %v2229_v23, %v1095_v28  ;;  %v1097_v34 = vmul.f32 %v1746_v29, %v1746_v29 }
 0x16c   : > { %v1100_v35 = vmul.f32 %v2231_v26, %v1096_v31  ;;  %v1098_v36 = vmul.f32 %v1748_v32, %v1748_v32 }
 0x16d   : > { %v1103_v37 = vmul.f32 0.044715, %v1099_v33  ;;  %v1101_v38 = vmul.f32 %v1746_v29, %v1097_v34 }
 0x16e   : > { %v1104_v39 = vmul.f32 0.044715, %v1100_v35  ;;  %v1102_v40 = vmul.f32 %v1748_v32, %v1098_v36 }
 0x16f   : > { %v1107_v41 = vadd.f32 %v2229_v23, %v1103_v37  ;;  %v1105_v42 = vmul.f32 0.044715, %v1101_v38 }
 0x170   : > { %v1106_v43 = vmul.f32 0.044715, %v1102_v40  ;;  %v1108_v44 = vadd.f32 %v2231_v26, %v1104_v39 }
 0x171   : > { %v1111_v45 = vmul.f32 0.7978846, %v1107_v41  ;;  %v1109_v46 = vadd.f32 %v1746_v29, %v1105_v42 }
 0x172   : > { %v1110_v47 = vadd.f32 %v1748_v32, %v1106_v43  ;;  %v1112_v48 = vmul.f32 0.7978846, %v1108_v44 }
 0x173   : > { %1980 = vtanh.f32 %v1111_v45  ;;  %v1113_v49 = vmul.f32 0.7978846, %v1109_v46  ;;  %v1393_v46 = vsub.s32 2, %v2218_v11 }
 0x174   : > { %v1114_v50 = vmul.f32 0.7978846, %v1110_v47  ;;  %1982 = vtanh.f32 %v1112_v48  ;;  %v1397_v47 = vsub.s32 6, %v2218_v11 }
 0x175   : > { %1984 = vtanh.f32 %v1113_v49  ;;  %v1415_v49 = vsub.s32 3, %v2218_v11 }
 0x176   : > { %1986 = vtanh.f32 %v1114_v50  ;;  %v1419_v50 = vsub.s32 7, %v2218_v11 }
 0x17d   : > { %v1981_v51 = vpop.eup %1980 }
 0x17e   : > { %v1983_v52 = vpop.eup %1982  ;;  %v1119_v53 = vadd.f32 1.0, %v1981_v51  ;;  %v1394_v51 = vrot.slane %v2224_v13, %v1393_v46 }
 0x17f   : > { %v1985_v54 = vpop.eup %1984  ;;  %v1120_v55 = vadd.f32 1.0, %v1983_v52  ;;  %v1398_v52 = vrot.slane %v2224_v13, %v1397_v47 }
 0x180   : > { %v1987_v56 = vpop.eup %1986  ;;  %v1121_v57 = vadd.f32 1.0, %v1985_v54  ;;  %v1123_v60 = vmul.f32 0.5, %v1119_v53  ;;  %v1416_v53 = vrot.slane %v2224_v13, %v1415_v49  ;;  %v1420_v54 = vrot.slane %v2224_v13, %v1419_v50 }
 0x181   : > { %v1122_v58 = vadd.f32 1.0, %v1987_v56  ;;  %v1124_v59 = vmul.f32 0.5, %v1120_v55  ;;  %v1404_v55 = vrot.slane %v1394_v51, %v1393_v46  ;;  %v1408_v56 = vrot.slane %v1398_v52, %v1393_v46 }
 0x182   : > { %v1125_v61 = vmul.f32 0.5, %v1121_v57  ;;  %v1127_v2 = vmul.f32 %v2229_v23, %v1123_v60  ;;  %v1426_v60 = vrot.slane %v1416_v53, %v1415_v49 }
 0x183   : > { %v1126_v62 = vmul.f32 0.5, %v1122_v58  ;;  %v1128_v0 = vmul.f32 %v2231_v26, %v1124_v59 }
 0x184   : > { %v1129_v63 = vmul.f32 %v1746_v29, %v1125_v61  ;;  %v1430_v61 = vrot.slane %v1420_v54, %v1415_v49 }
 0x185   : > { %v1130_v1 = vmul.f32 %v1748_v32, %v1126_v62 }
 0x186   : > { %v1131_v4 = vpack.c.bf16 %v1129_v63, %v1127_v2 }
 0x187   : > { %v1132_v3 = vpack.c.bf16 %v1130_v1, %v1128_v0 }
 0x189   : > { %1343 = vmatprep.mubr.bf16.mxu1 %v1132_v3 }
 0x18a   : > { %1344 = vmatmul.mubr.bf16.vlgmr.msra.gmra.mrb[4].mxu1 %v1131_v4 }
 0x25d   : > { %v1345_v12 = vpop.f32.mrb[4].mxu1 }
 0x25e   : > { %v1346_v14 = vadd.f32 %v1345_v12, %v1146_v9  ;;  %v1347_v15 = vpop.f32.mrb[5].mxu1 }
 0x25f   : > { %v1348_v16 = vadd.f32 %v1347_v15, %v1150_v10  ;;  %v1349_v17 = vpop.f32.mrb[6].mxu1 }
 0x260   : > { %v1350_v18 = vadd.f32 %v1349_v17, %v1146_v9  ;;  %v1351_v19 = vpop.f32.mrb[7].mxu1  ;;  %v1354_v20 = vadd.f32 %v2229_v23, %v1346_v14 }
 0x261   : > { %v1352_v21 = vadd.f32 %v1351_v19, %v1150_v10  ;;  %v1355_v22 = vadd.f32 %v2231_v26, %v1348_v16 }
 0x262   : > { %v1356_v24 = vadd.f32 %v1746_v29, %v1350_v18 }
 0x263   : > { %v1357_v25 = vadd.f32 %v1748_v32, %v1352_v21  ;;  %v1358_v27 = vadd.f32 %v1355_v22, %v1354_v20 }
 0x265   : > { %1359 = vadd.xlane.f32.xlu0 %v1358_v27  ;;  %v1361_v28 = vadd.f32 %v1357_v25, %v1356_v24 }
 0x269   : > { %1362 = vadd.xlane.f32.xlu0 %v1361_v28 }
 0x2f2   : > { %v1360_v30 = vpop.xlane.xlu0 %1359 }
 0x2f3   : > { %v1365_v31 = vmul.f32 0.00390625, %v1360_v30 }
 0x2f5   : > { %v1367_v33 = vsub.f32 %v1354_v20, %v1365_v31  ;;  %v1368_v34 = vsub.f32 %v1355_v22, %v1365_v31 }
 0x2f6   : > { %v1363_v35 = vpop.xlane.xlu0 %1362 }
 0x2f7   : > { %v1366_v36 = vmul.f32 0.00390625, %v1363_v35  ;;  %v1371_v37 = vmul.f32 %v1367_v33, %v1367_v33  ;;  %v1372_v38 = vmul.f32 %v1368_v34, %v1368_v34 }
 0x2f9   : > { %v1369_v39 = vsub.f32 %v1356_v24, %v1366_v36  ;;  %v1370_v40 = vsub.f32 %v1357_v25, %v1366_v36  ;;  %v1375_v23 = vadd.f32 %v1372_v38, %v1371_v37 }
 0x2fb   : > { %1376 = vadd.xlane.f32.xlu1 %v1375_v23  ;;  %v1373_v41 = vmul.f32 %v1369_v39, %v1369_v39  ;;  %v1374_v26 = vmul.f32 %v1370_v40, %v1370_v40 }
 0x2fd   : > { %v1378_v29 = vadd.f32 %v1374_v26, %v1373_v41 }
 0x2ff   : > { %1379 = vadd.xlane.f32.xlu1 %v1378_v29 }
 0x388   : > { %v1377_v32 = vpop.xlane.xlu1 %1376 }
 0x389   : > { %v1381_v42 = vmul.f32 0.00390625, %v1377_v32 }
 0x38b   : > { %v1383_v43 = vadd.f32 1e-05, %v1381_v42 }
 0x38c   : > { %v1380_v44 = vpop.xlane.xlu1 %1379 }
 0x38d   : > { %1988 = vrsqrt.f32 %v1383_v43  ;;  %v1382_v45 = vmul.f32 0.00390625, %v1380_v44 }
 0x38f   : > { %v1384_v48 = vadd.f32 1e-05, %v1382_v45 }
 0x391   : > { %1990 = vrsqrt.f32 %v1384_v48 }
 0x397   : > { %v1989_v57 = vpop.eup %1988 }
 0x398   : > { %v1387_v58 = vmul.f32 %v1989_v57, %v1367_v33  ;;  %v1388_v59 = vmul.f32 %v1989_v57, %v1368_v34 }
 0x39a   : > { %v1409_v62 = vmul.f32 %v1404_v55, %v1387_v58  ;;  %v1410_v63 = vmul.f32 %v1408_v56, %v1388_v59 }
 0x39b   : > { %v1991_v0 = vpop.eup %1990 }
 0x39c   : > { %v1431_v11 = vadd.f32 %v1426_v60, %v1409_v62  ;;  %v1432_v1 = vadd.f32 %v1430_v61, %v1410_v63  ;;  %v1389_v2 = vmul.f32 %v1991_v0, %v1369_v39  ;;  %v1390_v3 = vmul.f32 %v1991_v0, %v1370_v40 }
 0x39e   : > { %v1435_v4 = vmul.f32 %v1431_v11, %v1431_v11  ;;  %v1436_v5 = vmul.f32 %v1432_v1, %v1432_v1  ;;  %v1411_v6 = vmul.f32 %v1404_v55, %v1389_v2  ;;  %v1412_v7 = vmul.f32 %v1408_v56, %v1390_v3 }
 0x3a0   : > { %v1439_v13 = vadd.f32 %v1436_v5, %v1435_v4  ;;  %v1433_v8 = vadd.f32 %v1426_v60, %v1411_v6  ;;  %v1434_v9 = vadd.f32 %v1430_v61, %v1412_v7 }
 0x3a2   : > { %1440 = vadd.xlane.f32.xlu0 %v1439_v13  ;;  %v1437_v10 = vmul.f32 %v1433_v8, %v1433_v8  ;;  %v1438_v12 = vmul.f32 %v1434_v9, %v1434_v9 }
 0x3a4   : > { %v1442_v14 = vadd.f32 %v1438_v12, %v1437_v10 }
 0x3a6   : > { %1443 = vadd.xlane.f32.xlu1 %v1442_v14 }
 0x42f   : > { %v1441_v15 = vpop.xlane.xlu0 %1440 }
 0x430   : > { %v1445_v16 = vmax.f32 %v1441_v15, 1e-24 }
 0x432   : > { %1992 = vrsqrt.f32 %v1445_v16 }
 0x433   : > { %v1444_v17 = vpop.xlane.xlu1 %1443 }
 0x434   : > { %v1446_v18 = vmax.f32 %v1444_v17, 1e-24 }
 0x436   : > { %1994 = vrsqrt.f32 %v1446_v18 }
 0x43c   : > { %v1993_v19 = vpop.eup %1992 }
 0x43d   : > { %v1449_v20 = vmul.f32 %v1993_v19, %v1431_v11  ;;  %v1450_v21 = vmul.f32 %v1993_v19, %v1432_v1 }
 0x43f   : > { %1453 = vst [vmem:[%s300_s12] sm:$0xff] %v1449_v20  ;;  %1454 = vst [vmem:[%s300_s12 + $0x8] sm:$0xff] %v1450_v21 }
 0x440   : > { %v1995_v22 = vpop.eup %1994 }
 0x441   : > { %v1451_v24 = vmul.f32 %v1995_v22, %v1433_v8  ;;  %v1452_v25 = vmul.f32 %v1995_v22, %v1434_v9 }
 0x443   : > { %1455 = vst [vmem:[%s300_s12 + $0x10] sm:$0xff] %v1451_v24  ;;  %1456 = vst [vmem:[%s300_s12 + $0x18] sm:$0xff] %v1452_v25 }
 0x444 PF: > { %s14_s17 = sadd.s32 1, %s2018_s17   ;;  %s2275_s15 = smov %s2014_s16 }
 0x445   : > { %p11_p5 = scmp.ge.s32.totalorder %s14_s17, 4   ;;  %s2276_s16 = smov %s2278_s18 }
 0x447   :  { %13 = sbr.rel (!%p11_p5) target bundleno = 2 (0x2), region = 75 }

</bundles_post_ra>
